<compile_context>
chip_gen: v6e
topology: v6e:2x2x1
jax: 0.10.0
libtpu: 0.0.40
codegen_flags: <defaults>
</compile_context>

<pallas_src>
import math
import functools

import jax
import jax.numpy as jnp
from jax.experimental import pallas as pl
from jax.experimental.pallas import tpu as pltpu


_INV_SQRT2 = 1.0 / math.sqrt(2.0)
_LANE = 128


def _round_up(a: int, b: int) -> int:
    return ((a + b - 1) // b) * b


@functools.lru_cache(maxsize=1)
def _vmem_capacity_bytes() -> int:
    """Per-TensorCore VMEM capacity; conservative fallback (v7x = 64 MiB)."""
    try:
        return int(pltpu.get_tpu_info().vmem_capacity_bytes)
    except Exception:
        return 64 * 1024 * 1024


def _gelu(h, approximate: bool):
    if approximate:
        # tanh approximation -> EUP slot (frees VALU); numerics differ slightly.
        return jax.nn.gelu(h, approximate=True)
    # Exact (erf-based) GELU, matching nn.GELU() default (approximate='none').
    return 0.5 * h * (1.0 + jax.lax.erf(h * _INV_SQRT2))


def ffn_kernel_f32out(x_ref, w1_ref, b1_ref, w2_ref, b2_ref, o_ref, *, approximate):
    """f32-output variant: accumulate directly into the resident output block."""
    k = pl.program_id(1)

    @pl.when(k == 0)
    def _():
        o_ref[...] = jnp.zeros_like(o_ref)

    # First linear, this hidden chunk: (tm, dim_p) @ (dim_p, tk) + (1, tk)
    h = jnp.dot(x_ref[...], w1_ref[...], preferred_element_type=jnp.float32) + b1_ref[...]
    h = _gelu(h, approximate)
    # Second linear, accumulated over hidden chunks: (tm, tk) @ (tk, dim_p).
    o_ref[...] += jnp.dot(h.astype(w2_ref.dtype), w2_ref[...],
                          preferred_element_type=jnp.float32)

    @pl.when(k == pl.num_programs(1) - 1)
    def _():
        o_ref[...] += b2_ref[...]


def ffn_kernel_scratch(x_ref, w1_ref, b1_ref, w2_ref, b2_ref, o_ref, acc_ref, *,
                       approximate):
    """Non-f32-output variant: f32 VMEM accumulator, single cast-and-store at the end."""
    k = pl.program_id(1)

    @pl.when(k == 0)
    def _():
        acc_ref[...] = jnp.zeros_like(acc_ref)

    h = jnp.dot(x_ref[...], w1_ref[...], preferred_element_type=jnp.float32) + b1_ref[...]
    h = _gelu(h, approximate)
    acc_ref[...] += jnp.dot(h.astype(w2_ref.dtype), w2_ref[...],
                            preferred_element_type=jnp.float32)

    @pl.when(k == pl.num_programs(1) - 1)
    def _():
        o_ref[...] = (acc_ref[...] + b2_ref[...]).astype(o_ref.dtype)


def _select_tiles(M, dim_p, hidden, in_itemsize, out_itemsize, separate_acc,
                  vmem_budget):
    """Pick (tm, tk): largest row tile that fits (amortizes weight streaming)."""
    # Clamp tm to the real token count for decode-like small-M calls.
    tm = min(512, max(128, _round_up(M, 128)))
    tk = min(512, _round_up(hidden, _LANE))

    def usage(tm_, tk_):
        return (2 * tm_ * dim_p * in_itemsize            # x (double-buffered)
                + 2 * dim_p * tk_ * in_itemsize          # W1
                + 2 * tk_ * dim_p * in_itemsize          # W2
                + 2 * 8 * tk_ * 4 + 2 * 8 * dim_p * 4    # b1, b2 (sublane-padded, f32)
                + 2 * tm_ * dim_p * out_itemsize         # out
                + (tm_ * dim_p * 4 if separate_acc else 0))  # f32 accumulator

    # Shrink the hidden chunk first (only costs grid steps), then rows.
    while usage(tm, tk) > vmem_budget and tk > _LANE:
        tk = max(_LANE, _round_up(tk // 2, _LANE))
    while usage(tm, tk) > vmem_budget and tm > 128:
        tm = max(128, _round_up(tm // 2, 128))
    return tm, tk


@functools.partial(jax.jit, static_argnames=("compute_dtype", "gelu_approximate"))
def feed_forward(x, w1, b1, w2, b2, *, compute_dtype=None, gelu_approximate=False):
    """x: [B, S, dim]; w1: [dim, hidden]; b1: [hidden]; w2: [hidden, dim]; b2: [dim]."""
    B, S, dim = x.shape
    hidden = w1.shape[1]
    M = B * S

    out_dtype = jnp.dtype(x.dtype)
    cdtype = jnp.dtype(compute_dtype) if compute_dtype is not None else out_dtype
    separate_acc = out_dtype != jnp.dtype(jnp.float32)

    dim_p = _round_up(dim, _LANE)

    vmem_cap = _vmem_capacity_bytes()
    vmem_budget = int(vmem_cap * 0.80)          # headroom for Mosaic internals
    tm, tk = _select_tiles(M, dim_p, hidden, cdtype.itemsize, out_dtype.itemsize,
                           separate_acc, vmem_budget)
    hidden_p = _round_up(hidden, tk)
    M_pad = _round_up(M, tm)

    # Activations: padded + cast per call (cheap: O(M*dim)).
    x2 = x.reshape(M, dim)
    if (M_pad, dim_p) != (M, dim):
        x2 = jnp.pad(x2, ((0, M_pad - M), (0, dim_p - dim)))
    x2 = x2.astype(cdtype)

    # Weights: only pad when actually misaligned (usually a no-op -> no HBM copy).
    # TODO(synk): for repeated inference, store weights pre-padded / pre-cast to
    # compute_dtype outside this call to avoid any per-call weight materialization.
    w1p = w1 if (dim_p == dim and hidden_p == hidden) else jnp.pad(
        w1, ((0, dim_p - dim), (0, hidden_p - hidden)))
    w2p = w2 if (hidden_p == hidden and dim_p == dim) else jnp.pad(
        w2, ((0, hidden_p - hidden), (0, dim_p - dim)))
    w1p = w1p.astype(cdtype)
    w2p = w2p.astype(cdtype)

    # Biases stay f32 (tiny; added on the f32 accumulation path).
    b1p = (b1 if hidden_p == hidden else jnp.pad(b1, (0, hidden_p - hidden)))
    b1p = b1p.astype(jnp.float32).reshape(1, hidden_p)
    b2p = (b2 if dim_p == dim else jnp.pad(b2, (0, dim_p - dim)))
    b2p = b2p.astype(jnp.float32).reshape(1, dim_p)

    grid = (M_pad // tm, hidden_p // tk)
    n_row_tiles = grid[0]

    cost = pl.CostEstimate(
        flops=4 * M_pad * dim_p * hidden_p,              # two matmuls
        transcendentals=M_pad * hidden_p,                # GELU per hidden activation
        bytes_accessed=(M_pad * dim_p * cdtype.itemsize                      # x read
                        + M_pad * dim_p * out_dtype.itemsize                 # out write
                        + n_row_tiles * 2 * dim_p * hidden_p * cdtype.itemsize),  # weights re-streamed per row tile
    )

    in_specs = [
        pl.BlockSpec((tm, dim_p), lambda i, k: (i, 0)),    # x row tile
        pl.BlockSpec((dim_p, tk), lambda i, k: (0, k)),    # W1 hidden chunk
        pl.BlockSpec((1, tk), lambda i, k: (0, k)),        # b1 hidden chunk
        pl.BlockSpec((tk, dim_p), lambda i, k: (k, 0)),    # W2 hidden chunk
        pl.BlockSpec((1, dim_p), lambda i, k: (0, 0)),     # b2
    ]
    out_spec = pl.BlockSpec((tm, dim_p), lambda i, k: (i, 0))

    if separate_acc:
        kernel = functools.partial(ffn_kernel_scratch, approximate=gelu_approximate)
        scratch = [pltpu.VMEM((tm, dim_p), jnp.float32)]
    else:
        kernel = functools.partial(ffn_kernel_f32out, approximate=gelu_approximate)
        scratch = []

    out2 = pl.pallas_call(
        kernel,
        out_shape=jax.ShapeDtypeStruct((M_pad, dim_p), out_dtype),
        grid_spec=pltpu.PrefetchScalarGridSpec(
            num_scalar_prefetch=0,
            grid=grid,
            in_specs=in_specs,
            out_specs=out_spec,
            scratch_shapes=scratch,
        ),
        compiler_params=pltpu.CompilerParams(
            dimension_semantics=("parallel", "arbitrary"),
            vmem_limit_bytes=min(vmem_cap, vmem_budget + (8 << 20)),
        ),
        cost_estimate=cost,
    )(x2, w1p, b1p, w2p, b2p)

    return out2[:M, :dim].reshape(B, S, dim)


if __name__ == "__main__":
    # Small shapes consistent with the module: tokens of size `dim`, MLP hidden `hidden_dim`.
    B, S, dim, hidden = 2, 8, 32, 128
    key = jax.random.PRNGKey(0)
    kx, kw1, kb1, kw2, kb2 = jax.random.split(key, 5)

    # Deterministic parameter init (mimics PyTorch Linear's U(-1/sqrt(fan_in), ...)).
    lim1 = 1.0 / math.sqrt(dim)
    lim2 = 1.0 / math.sqrt(hidden)
    w1 = jax.random.uniform(kw1, (dim, hidden), jnp.float32, -lim1, lim1)   # Linear(dim, hidden).weight.T
    b1 = jax.random.uniform(kb1, (hidden,), jnp.float32, -lim1, lim1)
    w2 = jax.random.uniform(kw2, (hidden, dim), jnp.float32, -lim2, lim2)   # Linear(hidden, dim).weight.T
    b2 = jax.random.uniform(kb2, (dim,), jnp.float32, -lim2, lim2)

    x = jax.random.normal(kx, (B, S, dim), jnp.float32)

    # Reference in plain JAX (exact-erf GELU, dropout p=0 is identity).
    h_ref = x.reshape(-1, dim) @ w1 + b1
    h_ref = 0.5 * h_ref * (1.0 + jax.lax.erf(h_ref / math.sqrt(2.0)))
    y_ref = (h_ref @ w2 + b2).reshape(B, S, dim)

    # 1) Default path: f32 everywhere, exact numerics (direct-into-output accumulation).
    out = jax.block_until_ready(feed_forward(x, w1, b1, w2, b2))
    assert out.shape == y_ref.shape, "shape mismatch vs reference"
    assert jnp.allclose(out, y_ref, atol=1e-5, rtol=1e-5), "f32 mismatch vs reference"

    # 2) Opt-in bf16 MXU path (exercises the scratch-accumulator kernel; looser tol).
    out_bf = jax.block_until_ready(
        feed_forward(x.astype(jnp.bfloat16), w1, b1, w2, b2,
                     compute_dtype=jnp.bfloat16))
    assert jnp.allclose(out_bf.astype(jnp.float32), y_ref, atol=1e-1, rtol=1e-1), \
        "bf16 mismatch vs reference"

    print("KERNEL_OK")
</pallas_src>

<mosaic_0001>
module attributes {stable_mosaic.version = 11 : i64} {
  func.func @ffn_kernel_f32out(%arg0: i32, %arg1: i32, %arg2: memref<128x128xf32, #tpu.memory_space<vmem>>, %arg3: memref<128x128xf32, #tpu.memory_space<vmem>>, %arg4: memref<1x128xf32, #tpu.memory_space<vmem>>, %arg5: memref<128x128xf32, #tpu.memory_space<vmem>>, %arg6: memref<1x128xf32, #tpu.memory_space<vmem>>, %arg7: memref<128x128xf32, #tpu.memory_space<vmem>>) attributes {dimension_semantics = [#tpu.dimension_semantics<parallel>, #tpu.dimension_semantics<arbitrary>], iteration_bounds = array<i64: 1, 1>, scalar_prefetch = 0 : i64, scratch_operands = 0 : i64, tpu.core_type = #tpu.core_type<tc>, window_params = [{transform_indices = @transform_0, window_bounds = array<i64: 128, 128>}, {transform_indices = @transform_1, window_bounds = array<i64: 128, 128>}, {transform_indices = @transform_2, window_bounds = array<i64: 1, 128>}, {transform_indices = @transform_3, window_bounds = array<i64: 128, 128>}, {pipeline_mode = #tpu.pipeline_mode<synchronous>, transform_indices = @transform_4, window_bounds = array<i64: 1, 128>}, {transform_indices = @transform_5, window_bounds = array<i64: 128, 128>}]} {
    %c0_i32 = arith.constant 0 : i32
    %0 = arith.cmpi eq, %arg1, %c0_i32 : i32
    %1 = arith.extui %0 : i1 to i32
    %c0_i32_0 = arith.constant 0 : i32
    %2 = arith.cmpi ne, %1, %c0_i32_0 : i32
    scf.if %2 {
      %cst_18 = arith.constant 0.000000e+00 : f32
      %25 = vector.broadcast %cst_18 : f32 to vector<128x128xf32>
      %c0_19 = arith.constant 0 : index
      %c0_20 = arith.constant 0 : index
      %26 = vector.load %arg7[%c0_19, %c0_20] : memref<128x128xf32, #tpu.memory_space<vmem>>, vector<128x128xf32>
      tpu.vector_store %arg7[%c0_19, %c0_20], %25 {strides = array<i32>} : memref<128x128xf32, #tpu.memory_space<vmem>>, vector<128x128xf32>,
    } else {
    }
    %c0 = arith.constant 0 : index
    %c0_1 = arith.constant 0 : index
    %3 = vector.load %arg2[%c0, %c0_1] : memref<128x128xf32, #tpu.memory_space<vmem>>, vector<128x128xf32>
    %c0_2 = arith.constant 0 : index
    %c0_3 = arith.constant 0 : index
    %4 = vector.load %arg3[%c0_2, %c0_3] : memref<128x128xf32, #tpu.memory_space<vmem>>, vector<128x128xf32>
    %cst = arith.constant dense<0.000000e+00> : vector<128x128xf32>
    %5 = tpu.matmul %3, %4, %cst {dimension_numbers = #tpu.dot_dimension_numbers<[1], [0], [0], [1], [0, 0, 1, 1], [], []>} : vector<128x128xf32>, vector<128x128xf32>, vector<128x128xf32> -> vector<128x128xf32>
    %c0_4 = arith.constant 0 : index
    %c0_5 = arith.constant 0 : index
    %6 = vector.load %arg4[%c0_4, %c0_5] : memref<1x128xf32, #tpu.memory_space<vmem>>, vector<1x128xf32>
    %7 = vector.broadcast %6 : vector<1x128xf32> to vector<128x128xf32>
    %8 = arith.addf %5, %7 : vector<128x128xf32>
    %cst_6 = arith.constant 5.000000e-01 : f32
    %9 = vector.broadcast %cst_6 : f32 to vector<128x128xf32>
    %10 = arith.mulf %9, %8 : vector<128x128xf32>
    %cst_7 = arith.constant 0.707106769 : f32
    %11 = vector.broadcast %cst_7 : f32 to vector<128x128xf32>
    %12 = arith.mulf %8, %11 : vector<128x128xf32>
    %13 = math.erf %12 : vector<128x128xf32>
    %cst_8 = arith.constant 1.000000e+00 : f32
    %14 = vector.broadcast %cst_8 : f32 to vector<128x128xf32>
    %15 = arith.addf %14, %13 : vector<128x128xf32>
    %16 = arith.mulf %10, %15 : vector<128x128xf32>
    %c0_9 = arith.constant 0 : index
    %c0_10 = arith.constant 0 : index
    %17 = vector.load %arg7[%c0_9, %c0_10] : memref<128x128xf32, #tpu.memory_space<vmem>>, vector<128x128xf32>
    %c0_11 = arith.constant 0 : index
    %c0_12 = arith.constant 0 : index
    %18 = vector.load %arg5[%c0_11, %c0_12] : memref<128x128xf32, #tpu.memory_space<vmem>>, vector<128x128xf32>
    %cst_13 = arith.constant dense<0.000000e+00> : vector<128x128xf32>
    %19 = tpu.matmul %16, %18, %cst_13 {dimension_numbers = #tpu.dot_dimension_numbers<[1], [0], [0], [1], [0, 0, 1, 1], [], []>} : vector<128x128xf32>, vector<128x128xf32>, vector<128x128xf32> -> vector<128x128xf32>
    %20 = arith.addf %17, %19 : vector<128x128xf32>
    %c0_14 = arith.constant 0 : index
    %c0_15 = arith.constant 0 : index
    %21 = vector.load %arg7[%c0_14, %c0_15] : memref<128x128xf32, #tpu.memory_space<vmem>>, vector<128x128xf32>
    tpu.vector_store %arg7[%c0_14, %c0_15], %20 {strides = array<i32>} : memref<128x128xf32, #tpu.memory_space<vmem>>, vector<128x128xf32>,
    %c0_i32_16 = arith.constant 0 : i32
    %22 = arith.cmpi eq, %arg1, %c0_i32_16 : i32
    %23 = arith.extui %22 : i1 to i32
    %c0_i32_17 = arith.constant 0 : i32
    %24 = arith.cmpi ne, %23, %c0_i32_17 : i32
    scf.if %24 {
      %c0_18 = arith.constant 0 : index
      %c0_19 = arith.constant 0 : index
      %25 = vector.load %arg7[%c0_18, %c0_19] : memref<128x128xf32, #tpu.memory_space<vmem>>, vector<128x128xf32>
      %c0_20 = arith.constant 0 : index
      %c0_21 = arith.constant 0 : index
      %26 = vector.load %arg6[%c0_20, %c0_21] : memref<1x128xf32, #tpu.memory_space<vmem>>, vector<1x128xf32>
      %27 = vector.broadcast %26 : vector<1x128xf32> to vector<128x128xf32>
      %28 = arith.addf %25, %27 : vector<128x128xf32>
      %c0_22 = arith.constant 0 : index
      %c0_23 = arith.constant 0 : index
      %29 = vector.load %arg7[%c0_22, %c0_23] : memref<128x128xf32, #tpu.memory_space<vmem>>, vector<128x128xf32>
      tpu.vector_store %arg7[%c0_22, %c0_23], %28 {strides = array<i32>} : memref<128x128xf32, #tpu.memory_space<vmem>>, vector<128x128xf32>,
    } else {
    }
    return
  }
  func.func @transform_0(%arg0: i32, %arg1: i32) -> (i32, i32) {
    %c0_i32 = arith.constant 0 : i32
    %c0_i32_0 = arith.constant 0 : i32
    return %arg0, %c0_i32 : i32, i32
  }
  func.func @transform_1(%arg0: i32, %arg1: i32) -> (i32, i32) {
    %c0_i32 = arith.constant 0 : i32
    %c0_i32_0 = arith.constant 0 : i32
    return %c0_i32, %arg1 : i32, i32
  }
  func.func @transform_2(%arg0: i32, %arg1: i32) -> (i32, i32) {
    %c0_i32 = arith.constant 0 : i32
    %c0_i32_0 = arith.constant 0 : i32
    return %c0_i32, %arg1 : i32, i32
  }
  func.func @transform_3(%arg0: i32, %arg1: i32) -> (i32, i32) {
    %c0_i32 = arith.constant 0 : i32
    %c0_i32_0 = arith.constant 0 : i32
    return %arg1, %c0_i32 : i32, i32
  }
  func.func @transform_4(%arg0: i32, %arg1: i32) -> (i32, i32) {
    %c0_i32 = arith.constant 0 : i32
    %c0_i32_0 = arith.constant 0 : i32
    %c0_i32_1 = arith.constant 0 : i32
    return %c0_i32, %c0_i32_0 : i32, i32
  }
  func.func @transform_5(%arg0: i32, %arg1: i32) -> (i32, i32) {
    %c0_i32 = arith.constant 0 : i32
    %c0_i32_0 = arith.constant 0 : i32
    return %arg0, %c0_i32 : i32, i32
  }
}

</mosaic_0001>

<bundles_post_ra>
// kernel: feed_forward.1
= control target key start
LH: loop header
LB: loop body
LE: loop exit
PB: predicated region body
PF: predicated region fallthrough
CT: control target
= control target key end

     0   :  { %s1052_s1 = inlined_call_operand.vmem [shape: f32[128,128], index: 1, kind: input, shape index: {}]   ;;  %s1053_s0 = inlined_call_operand.vmem [shape: f32[128,128], index: 0, kind: input, shape index: {}]   ;;  %s1054_s3 = inlined_call_operand.vmem [shape: f32[128,128], index: 3, kind: input, shape index: {}]   ;;  %s1055_s2 = inlined_call_operand.vmem [shape: f32[1,128], index: 2, kind: input, shape index: {}]   ;;  %s1056_s4 = inlined_call_operand.vmem [shape: f32[1,128], index: 4, kind: input, shape index: {}]   ;;  %s1057_s5 = inlined_call_operand.vmem [shape: f32[128,128], index: 5, kind: output, shape index: {}]  }
   0x1   :  { %v71_v0 = vld [vmem:[%s1052_s1 + $0x78] sm:$0xff]  ;;  %v70_v1 = vld [vmem:[%s1052_s1 + $0x70] sm:$0xff]  ;;  %v69_v2 = vld [vmem:[%s1052_s1 + $0x68] sm:$0xff] }
   0x2   :  { %641 = vmatprep.subr.mxu0 %v71_v0  ;;  %v68_v3 = vld [vmem:[%s1052_s1 + $0x60] sm:$0xff]  ;;  %v67_v5 = vld [vmem:[%s1052_s1 + $0x58] sm:$0xff]  ;;  %v66_v6 = vld [vmem:[%s1052_s1 + $0x50] sm:$0xff] }
   0x3   :  { %642 = vmatpush3.msra.mxu0 %v71_v0  ;;  %v40_v4 = vld [vmem:[%s1053_s0] sm:$0xff]  ;;  %v65_v7 = vld [vmem:[%s1052_s1 + $0x48] sm:$0xff]  ;;  %v335_v8 = vld [vmem:[%s1054_s3 + $0x78] sm:$0xff] }
   0x4   :  { %643 = vmatprep.subr.mxu0 %v70_v1  ;;  %673 = vmatprep.mubr.f32.mxu0 %v40_v4  ;;  %v334_v9 = vld [vmem:[%s1054_s3 + $0x70] sm:$0xff]  ;;  %v64_v10 = vld [vmem:[%s1052_s1 + $0x40] sm:$0xff]  ;;  %v333_v11 = vld [vmem:[%s1054_s3 + $0x68] sm:$0xff] }
   0x5   :  { %644 = vmatpush3.msra.mxu0 %v70_v1  ;;  %697 = vmatprep.subr.mxu1 %v335_v8  ;;  %v63_v12 = vld [vmem:[%s1052_s1 + $0x38] sm:$0xff]  ;;  %v62_v13 = vld [vmem:[%s1052_s1 + $0x30] sm:$0xff]  ;;  %v61_v14 = vld [vmem:[%s1052_s1 + $0x28] sm:$0xff] }
   0x6   :  { %645 = vmatprep.subr.mxu0 %v69_v2  ;;  %698 = vmatpush3.msra.mxu1 %v335_v8  ;;  %v60_v15 = vld [vmem:[%s1052_s1 + $0x20] sm:$0xff]  ;;  %v59_v16 = vld [vmem:[%s1052_s1 + $0x18] sm:$0xff]  ;;  %v58_v17 = vld [vmem:[%s1052_s1 + $0x10] sm:$0xff] }
   0x7   :  { %646 = vmatpush3.msra.mxu0 %v69_v2  ;;  %699 = vmatprep.subr.mxu1 %v334_v9  ;;  %v57_v18 = vld [vmem:[%s1052_s1 + $0x8] sm:$0xff]  ;;  %v56_v19 = vld [vmem:[%s1052_s1] sm:$0xff]  ;;  %v42_v21 = vld [vmem:[%s1053_s0 + $0x10] sm:$0xff] }
   0x8   :  { %647 = vmatprep.subr.mxu0 %v68_v3  ;;  %700 = vmatpush3.msra.mxu1 %v334_v9  ;;  %v41_v20 = vld [vmem:[%s1053_s0 + $0x8] sm:$0xff]  ;;  %v43_v22 = vld [vmem:[%s1053_s0 + $0x18] sm:$0xff]  ;;  %v44_v23 = vld [vmem:[%s1053_s0 + $0x20] sm:$0xff] }
   0x9   :  { %648 = vmatpush3.msra.mxu0 %v68_v3  ;;  %701 = vmatprep.subr.mxu1 %v333_v11  ;;  %v45_v24 = vld [vmem:[%s1053_s0 + $0x28] sm:$0xff]  ;;  %v46_v25 = vld [vmem:[%s1053_s0 + $0x30] sm:$0xff]  ;;  %v47_v26 = vld [vmem:[%s1053_s0 + $0x38] sm:$0xff] }
   0xa   :  { %649 = vmatprep.subr.mxu0 %v67_v5  ;;  %702 = vmatpush3.msra.mxu1 %v333_v11  ;;  %v48_v27 = vld [vmem:[%s1053_s0 + $0x40] sm:$0xff]  ;;  %v49_v28 = vld [vmem:[%s1053_s0 + $0x48] sm:$0xff]  ;;  %v50_v29 = vld [vmem:[%s1053_s0 + $0x50] sm:$0xff] }
   0xb   :  { %650 = vmatpush3.msra.mxu0 %v67_v5  ;;  %v51_v30 = vld [vmem:[%s1053_s0 + $0x58] sm:$0xff]  ;;  %v52_v31 = vld [vmem:[%s1053_s0 + $0x60] sm:$0xff]  ;;  %v53_v32 = vld [vmem:[%s1053_s0 + $0x68] sm:$0xff] }
   0xc   :  { %651 = vmatprep.subr.mxu0 %v66_v6  ;;  %v54_v33 = vld [vmem:[%s1053_s0 + $0x70] sm:$0xff]  ;;  %v55_v34 = vld [vmem:[%s1053_s0 + $0x78] sm:$0xff]  ;;  %v332_v35 = vld [vmem:[%s1054_s3 + $0x60] sm:$0xff] }
   0xd   :  { %652 = vmatpush3.msra.mxu0 %v66_v6  ;;  %703 = vmatprep.subr.mxu1 %v332_v35  ;;  %v331_v36 = vld [vmem:[%s1054_s3 + $0x58] sm:$0xff]  ;;  %v330_v37 = vld [vmem:[%s1054_s3 + $0x50] sm:$0xff]  ;;  %v329_v38 = vld [vmem:[%s1054_s3 + $0x48] sm:$0xff] }
   0xe   :  { %653 = vmatprep.subr.mxu0 %v65_v7  ;;  %704 = vmatpush3.msra.mxu1 %v332_v35  ;;  %v328_v39 = vld [vmem:[%s1054_s3 + $0x40] sm:$0xff]  ;;  %v327_v40 = vld [vmem:[%s1054_s3 + $0x38] sm:$0xff]  ;;  %v326_v41 = vld [vmem:[%s1054_s3 + $0x30] sm:$0xff] }
   0xf   :  { %654 = vmatpush3.msra.mxu0 %v65_v7  ;;  %705 = vmatprep.subr.mxu1 %v331_v36  ;;  %v325_v42 = vld [vmem:[%s1054_s3 + $0x28] sm:$0xff]  ;;  %v324_v43 = vld [vmem:[%s1054_s3 + $0x20] sm:$0xff]  ;;  %v323_v44 = vld [vmem:[%s1054_s3 + $0x18] sm:$0xff] }
  0x10   :  { %655 = vmatprep.subr.mxu0 %v64_v10  ;;  %706 = vmatpush3.msra.mxu1 %v331_v36  ;;  %v322_v45 = vld [vmem:[%s1054_s3 + $0x10] sm:$0xff]  ;;  %v321_v46 = vld [vmem:[%s1054_s3 + $0x8] sm:$0xff]  ;;  %v320_v47 = vld [vmem:[%s1054_s3] sm:$0xff] }
  0x11   :  { %656 = vmatpush3.msra.mxu0 %v64_v10  ;;  %707 = vmatprep.subr.mxu1 %v330_v37  ;;  %v963_v48 = vld [vmem:[%s1055_s2] ss:$0 sm:$0xff] }
  0x12   :  { %657 = vmatprep.subr.mxu0 %v63_v12  ;;  %708 = vmatpush3.msra.mxu1 %v330_v37 }
  0x13   :  { %658 = vmatpush3.msra.mxu0 %v63_v12  ;;  %709 = vmatprep.subr.mxu1 %v329_v38 }
  0x14   :  { %659 = vmatprep.subr.mxu0 %v62_v13  ;;  %710 = vmatpush3.msra.mxu1 %v329_v38 }
  0x15   :  { %660 = vmatpush3.msra.mxu0 %v62_v13  ;;  %711 = vmatprep.subr.mxu1 %v328_v39 }
  0x16   :  { %661 = vmatprep.subr.mxu0 %v61_v14  ;;  %712 = vmatpush3.msra.mxu1 %v328_v39 }
  0x17   :  { %662 = vmatpush3.msra.mxu0 %v61_v14  ;;  %713 = vmatprep.subr.mxu1 %v327_v40 }
  0x18   :  { %663 = vmatprep.subr.mxu0 %v60_v15  ;;  %714 = vmatpush3.msra.mxu1 %v327_v40 }
  0x19   :  { %664 = vmatpush3.msra.mxu0 %v60_v15  ;;  %715 = vmatprep.subr.mxu1 %v326_v41 }
  0x1a   :  { %665 = vmatprep.subr.mxu0 %v59_v16  ;;  %716 = vmatpush3.msra.mxu1 %v326_v41 }
  0x1b   :  { %666 = vmatpush3.msra.mxu0 %v59_v16  ;;  %717 = vmatprep.subr.mxu1 %v325_v42 }
  0x1c   :  { %667 = vmatprep.subr.mxu0 %v58_v17  ;;  %718 = vmatpush3.msra.mxu1 %v325_v42 }
  0x1d   :  { %668 = vmatpush3.msra.mxu0 %v58_v17  ;;  %719 = vmatprep.subr.mxu1 %v324_v43 }
  0x1e   :  { %669 = vmatprep.subr.mxu0 %v57_v18  ;;  %720 = vmatpush3.msra.mxu1 %v324_v43 }
  0x1f   :  { %670 = vmatpush3.msra.mxu0 %v57_v18  ;;  %721 = vmatprep.subr.mxu1 %v323_v44 }
  0x20   :  { %671 = vmatprep.subr.mxu0 %v56_v19  ;;  %722 = vmatpush3.msra.mxu1 %v323_v44 }
  0x21   :  { %672 = vmatpush3.msra.mxu0 %v56_v19  ;;  %723 = vmatprep.subr.mxu1 %v322_v45 }
  0x22   :  { %674 = vmatmul.mubr.f32.vlgmr.msra.gmra.mxu0 %v41_v20  ;;  %724 = vmatpush3.msra.mxu1 %v322_v45 }
  0x23   :  { %676 = vmatprep.mubr.f32.mxu0 %v42_v21  ;;  %725 = vmatprep.subr.mxu1 %v321_v46 }
  0x24   :  { %726 = vmatpush3.msra.mxu1 %v321_v46 }
  0x25   :  { %727 = vmatprep.subr.mxu1 %v320_v47 }
  0x26   :  { %677 = vmatmul.mubr.f32.gmra.mxu0 %v43_v22  ;;  %728 = vmatpush3.msra.mxu1 %v320_v47 }
  0x27   :  { %679 = vmatprep.mubr.f32.mxu0 %v44_v23 }
  0x2a   :  { %680 = vmatmul.mubr.f32.gmra.mxu0 %v45_v24 }
  0x2b   :  { %682 = vmatprep.mubr.f32.mxu0 %v46_v25 }
  0x2e   :  { %683 = vmatmul.mubr.f32.gmra.mxu0 %v47_v26 }
  0x2f   :  { %685 = vmatprep.mubr.f32.mxu0 %v48_v27 }
  0x32   :  { %686 = vmatmul.mubr.f32.gmra.mxu0 %v49_v28 }
  0x33   :  { %688 = vmatprep.mubr.f32.mxu0 %v50_v29 }
  0x36   :  { %689 = vmatmul.mubr.f32.gmra.mxu0 %v51_v30 }
  0x37   :  { %691 = vmatprep.mubr.f32.mxu0 %v52_v31 }
  0x3a   :  { %692 = vmatmul.mubr.f32.gmra.mxu0 %v53_v32 }
  0x3b   :  { %694 = vmatprep.mubr.f32.mxu0 %v54_v33 }
  0x3e   :  { %695 = vmatmul.mubr.f32.gmra.mxu0 %v55_v34 }
  0xe2   :  { %v675_v49 = vpop.f32.mrf.mxu0 }
  0xe3   :  { %v151_v50 = vadd.f32 %v675_v49, %v963_v48 }
  0xe4   :  { %v145_v51 = vpop.f32.mrf.mxu0 }
  0xe5   :  { %v241_v52 = vmul.f32 0.70710677, %v151_v50  ;;  %v146_v53 = vadd.f32 %v963_v48, %v145_v51  ;;  %v225_v21 = vmul.f32 0.5, %v151_v50 }
  0xe6   :  { %v678_v54 = vpop.f32.mrf.mxu0 }
  0xe7   :  { %754 = verf.f32 %v241_v52  ;;  %v240_v55 = vmul.f32 0.70710677, %v146_v53  ;;  %v161_v56 = vadd.f32 %v678_v54, %v963_v48  ;;  %v224_v23 = vmul.f32 0.5, %v146_v53 }
  0xe8   :  { %v155_v57 = vpop.f32.mrf.mxu0 }
  0xe9   :  { %756 = verf.f32 %v240_v55  ;;  %v243_v58 = vmul.f32 0.70710677, %v161_v56  ;;  %v156_v59 = vadd.f32 %v963_v48, %v155_v57  ;;  %v227_v38 = vmul.f32 0.5, %v161_v56 }
  0xea   :  { %v681_v60 = vpop.f32.mrf.mxu0 }
  0xeb   :  { %758 = verf.f32 %v243_v58  ;;  %v242_v61 = vmul.f32 0.70710677, %v156_v59  ;;  %v171_v62 = vadd.f32 %v681_v60, %v963_v48  ;;  %v226_v35 = vmul.f32 0.5, %v156_v59 }
  0xec   :  { %v165_v63 = vpop.f32.mrf.mxu0 }
  0xed   :  { %760 = verf.f32 %v242_v61  ;;  %v245_v0 = vmul.f32 0.70710677, %v171_v62  ;;  %v166_v1 = vadd.f32 %v963_v48, %v165_v63  ;;  %v229_v50 = vmul.f32 0.5, %v171_v62 }
  0xee   :  { %v684_v2 = vpop.f32.mrf.mxu0 }
  0xef   :  { %762 = verf.f32 %v245_v0  ;;  %v244_v3 = vmul.f32 0.70710677, %v166_v1  ;;  %v972_v4 = vadd.f32 %v684_v2, %v963_v48  ;;  %v228_v51 = vmul.f32 0.5, %v166_v1 }
  0xf0   :  { %v175_v5 = vpop.f32.mrf.mxu0 }
  0xf1   :  { %764 = verf.f32 %v244_v3  ;;  %v247_v6 = vmul.f32 0.70710677, %v972_v4  ;;  %v176_v7 = vadd.f32 %v963_v48, %v175_v5  ;;  %v231_v62 = vmul.f32 0.5, %v972_v4 }
  0xf2   :  { %v687_v8 = vpop.f32.mrf.mxu0 }
  0xf3   :  { %766 = verf.f32 %v247_v6  ;;  %v246_v9 = vmul.f32 0.70710677, %v176_v7  ;;  %v977_v10 = vadd.f32 %v687_v8, %v963_v48  ;;  %v230_v57 = vmul.f32 0.5, %v176_v7 }
  0xf4   :  { %v755_v11 = vpop.eup %754  ;;  %v185_v12 = vpop.f32.mrf.mxu0 }
  0xf5   :  { %768 = verf.f32 %v246_v9  ;;  %v249_v13 = vmul.f32 0.70710677, %v977_v10  ;;  %v981_v14 = vadd.f32 %v963_v48, %v185_v12  ;;  %v273_v17 = vadd.f32 1.0, %v755_v11 }
  0xf6   :  { %v757_v15 = vpop.eup %756  ;;  %v690_v16 = vpop.f32.mrf.mxu0  ;;  %v233_v8 = vmul.f32 0.5, %v977_v10 }
  0xf7   :  { %770 = verf.f32 %v249_v13  ;;  %v248_v18 = vmul.f32 0.70710677, %v981_v14  ;;  %v985_v19 = vadd.f32 %v690_v16, %v963_v48  ;;  %v272_v24 = vadd.f32 1.0, %v757_v15 }
  0xf8   :  { %v759_v20 = vpop.eup %758  ;;  %v195_v22 = vpop.f32.mrf.mxu0  ;;  %v289_v30 = vmul.f32 %v273_v17, %v225_v21  ;;  %v232_v3 = vmul.f32 0.5, %v981_v14 }
  0xf9   :  { %772 = verf.f32 %v248_v18  ;;  %v251_v25 = vmul.f32 0.70710677, %v985_v19  ;;  %v196_v26 = vadd.f32 %v963_v48, %v195_v22  ;;  %v288_v29 = vmul.f32 %v272_v24, %v224_v23 }
  0xfa   :  { %v761_v27 = vpop.eup %760  ;;  %v693_v28 = vpop.f32.mrf.mxu0  ;;  %v275_v33 = vadd.f32 1.0, %v759_v20  ;;  %v235_v17 = vmul.f32 0.5, %v985_v19 }
  0xfb   :  { %774 = verf.f32 %v251_v25  ;;  %v250_v31 = vmul.f32 0.70710677, %v196_v26  ;;  %v990_v32 = vadd.f32 %v693_v28, %v963_v48  ;;  %729 = vmatprep.mubr.f32.mxu1 %v288_v29  ;;  %v274_v37 = vadd.f32 1.0, %v761_v27 }
  0xfc   :  { %v763_v34 = vpop.eup %762  ;;  %v205_v36 = vpop.f32.mrf.mxu0  ;;  %730 = vmatmul.mubr.f32.vlgmr.msra.gmra.mxu1 %v289_v30  ;;  %v291_v47 = vmul.f32 %v275_v33, %v227_v38  ;;  %v234_v12 = vmul.f32 0.5, %v196_v26 }
  0xfd   :  { %776 = verf.f32 %v250_v31  ;;  %v253_v39 = vmul.f32 0.70710677, %v990_v32  ;;  %v206_v40 = vadd.f32 %v963_v48, %v205_v36  ;;  %v290_v43 = vmul.f32 %v274_v37, %v226_v35  ;;  %v576_v35 = vld [vmem:[%s1056_s4] ss:$0 sm:$0xff] }
  0xfe   :  { %v765_v41 = vpop.eup %764  ;;  %v696_v42 = vpop.f32.mrf.mxu0  ;;  %v277_v44 = vadd.f32 1.0, %v763_v34  ;;  %v237_v24 = vmul.f32 0.5, %v990_v32 }
  0xff   :  { %778 = verf.f32 %v253_v39  ;;  %v252_v45 = vmul.f32 0.70710677, %v206_v40  ;;  %v221_v46 = vadd.f32 %v696_v42, %v963_v48  ;;  %732 = vmatprep.mubr.f32.mxu1 %v290_v43  ;;  %v276_v53 = vadd.f32 1.0, %v765_v41 }
 0x100   :  { %v767_v49 = vpop.eup %766  ;;  %v215_v52 = vpop.f32.mrf.mxu0  ;;  %733 = vmatmul.mubr.f32.gmra.mxu1 %v291_v47  ;;  %v293_v59 = vmul.f32 %v277_v44, %v229_v50  ;;  %v236_v20 = vmul.f32 0.5, %v206_v40 }
 0x101   :  { %780 = verf.f32 %v252_v45  ;;  %v255_v54 = vmul.f32 0.70710677, %v221_v46  ;;  %v216_v55 = vadd.f32 %v963_v48, %v215_v52  ;;  %v292_v58 = vmul.f32 %v276_v53, %v228_v51 }
 0x102   :  { %v769_v56 = vpop.eup %768  ;;  %v279_v63 = vadd.f32 1.0, %v767_v49  ;;  %v239_v19 = vmul.f32 0.5, %v221_v46 }
 0x103   :  { %782 = verf.f32 %v255_v54  ;;  %v254_v60 = vmul.f32 0.70710677, %v216_v55  ;;  %v278_v61 = vadd.f32 1.0, %v769_v56  ;;  %735 = vmatprep.mubr.f32.mxu1 %v292_v58  ;;  %v238_v27 = vmul.f32 0.5, %v216_v55 }
 0x104   :  { %v771_v0 = vpop.eup %770  ;;  %736 = vmatmul.mubr.f32.gmra.mxu1 %v293_v59  ;;  %v295_v48 = vmul.f32 %v279_v63, %v231_v62 }
 0x105   :  { %784 = verf.f32 %v254_v60  ;;  %v294_v1 = vmul.f32 %v278_v61, %v230_v57  ;;  %v281_v6 = vadd.f32 1.0, %v771_v0 }
 0x106   :  { %v773_v2 = vpop.eup %772 }
 0x107   :  { %738 = vmatprep.mubr.f32.mxu1 %v294_v1  ;;  %v280_v5 = vadd.f32 1.0, %v773_v2  ;;  %v297_v13 = vmul.f32 %v281_v6, %v233_v8 }
 0x108   :  { %v775_v7 = vpop.eup %774  ;;  %739 = vmatmul.mubr.f32.gmra.mxu1 %v295_v48 }
 0x109   :  { %v296_v9 = vmul.f32 %v280_v5, %v232_v3  ;;  %v283_v15 = vadd.f32 1.0, %v775_v7 }
 0x10a   :  { %v777_v11 = vpop.eup %776 }
 0x10b   :  { %741 = vmatprep.mubr.f32.mxu1 %v296_v9  ;;  %v282_v4 = vadd.f32 1.0, %v777_v11  ;;  %v299_v21 = vmul.f32 %v283_v15, %v235_v17 }
 0x10c   :  { %v779_v16 = vpop.eup %778  ;;  %742 = vmatmul.mubr.f32.gmra.mxu1 %v297_v13 }
 0x10d   :  { %v298_v14 = vmul.f32 %v282_v4, %v234_v12  ;;  %v285_v23 = vadd.f32 1.0, %v779_v16 }
 0x10e   :  { %v781_v18 = vpop.eup %780 }
 0x10f   :  { %744 = vmatprep.mubr.f32.mxu1 %v298_v14  ;;  %v284_v22 = vadd.f32 1.0, %v781_v18  ;;  %v301_v28 = vmul.f32 %v285_v23, %v237_v24 }
 0x110   :  { %v783_v10 = vpop.eup %782  ;;  %745 = vmatmul.mubr.f32.gmra.mxu1 %v299_v21 }
 0x111   :  { %v300_v25 = vmul.f32 %v284_v22, %v236_v20  ;;  %v287_v30 = vadd.f32 1.0, %v783_v10 }
 0x112   :  { %v785_v26 = vpop.eup %784 }
 0x113   :  { %747 = vmatprep.mubr.f32.mxu1 %v300_v25  ;;  %v286_v29 = vadd.f32 1.0, %v785_v26  ;;  %v303_v33 = vmul.f32 %v287_v30, %v239_v19 }
 0x114   :  { %748 = vmatmul.mubr.f32.gmra.mxu1 %v301_v28 }
 0x115   :  { %v302_v31 = vmul.f32 %v286_v29, %v238_v27 }
 0x117   :  { %750 = vmatprep.mubr.f32.mxu1 %v302_v31 }
 0x118   :  { %751 = vmatmul.mubr.f32.gmra.mxu1 %v303_v33 }
 0x1bc   :  { %v731_v34 = vpop.f32.mrf.mxu1 }
 0x1bd   :  { %v540_v36 = vadd.f32 %v731_v34, %v576_v35 }
 0x1be   :  { %v402_v32 = vpop.f32.mrf.mxu1 }
 0x1bf   :  { %556 = vst [vmem:[%s1057_s5 + $0x8] sm:$0xff] %v540_v36  ;;  %v539_v38 = vadd.f32 %v576_v35, %v402_v32 }
 0x1c0   :  { %v734_v37 = vpop.f32.mrf.mxu1 }
 0x1c1   :  { %555 = vst [vmem:[%s1057_s5] sm:$0xff] %v539_v38  ;;  %v542_v40 = vadd.f32 %v734_v37, %v576_v35 }
 0x1c2   :  { %v412_v39 = vpop.f32.mrf.mxu1 }
 0x1c3   :  { %558 = vst [vmem:[%s1057_s5 + $0x18] sm:$0xff] %v542_v40  ;;  %v541_v42 = vadd.f32 %v576_v35, %v412_v39 }
 0x1c4   :  { %v737_v41 = vpop.f32.mrf.mxu1 }
 0x1c5   :  { %557 = vst [vmem:[%s1057_s5 + $0x10] sm:$0xff] %v541_v42  ;;  %v544_v44 = vadd.f32 %v737_v41, %v576_v35 }
 0x1c6   :  { %v422_v43 = vpop.f32.mrf.mxu1 }
 0x1c7   :  { %560 = vst [vmem:[%s1057_s5 + $0x28] sm:$0xff] %v544_v44  ;;  %v543_v46 = vadd.f32 %v576_v35, %v422_v43 }
 0x1c8   :  { %v740_v45 = vpop.f32.mrf.mxu1 }
 0x1c9   :  { %559 = vst [vmem:[%s1057_s5 + $0x20] sm:$0xff] %v543_v46  ;;  %v546_v49 = vadd.f32 %v740_v45, %v576_v35 }
 0x1ca   :  { %v432_v47 = vpop.f32.mrf.mxu1 }
 0x1cb   :  { %562 = vst [vmem:[%s1057_s5 + $0x38] sm:$0xff] %v546_v49  ;;  %v545_v51 = vadd.f32 %v576_v35, %v432_v47 }
 0x1cc   :  { %v743_v50 = vpop.f32.mrf.mxu1 }
 0x1cd   :  { %561 = vst [vmem:[%s1057_s5 + $0x30] sm:$0xff] %v545_v51  ;;  %v548_v53 = vadd.f32 %v743_v50, %v576_v35 }
 0x1ce   :  { %v442_v52 = vpop.f32.mrf.mxu1 }
 0x1cf   :  { %564 = vst [vmem:[%s1057_s5 + $0x48] sm:$0xff] %v548_v53  ;;  %v547_v55 = vadd.f32 %v576_v35, %v442_v52 }
 0x1d0   :  { %v746_v54 = vpop.f32.mrf.mxu1 }
 0x1d1   :  { %563 = vst [vmem:[%s1057_s5 + $0x40] sm:$0xff] %v547_v55  ;;  %v550_v57 = vadd.f32 %v746_v54, %v576_v35 }
 0x1d2   :  { %v452_v56 = vpop.f32.mrf.mxu1 }
 0x1d3   :  { %566 = vst [vmem:[%s1057_s5 + $0x58] sm:$0xff] %v550_v57  ;;  %v549_v59 = vadd.f32 %v576_v35, %v452_v56 }
 0x1d4   :  { %v749_v58 = vpop.f32.mrf.mxu1 }
 0x1d5   :  { %565 = vst [vmem:[%s1057_s5 + $0x50] sm:$0xff] %v549_v59  ;;  %v552_v61 = vadd.f32 %v749_v58, %v576_v35 }
 0x1d6   :  { %v462_v60 = vpop.f32.mrf.mxu1 }
 0x1d7   :  { %568 = vst [vmem:[%s1057_s5 + $0x68] sm:$0xff] %v552_v61  ;;  %v551_v0 = vadd.f32 %v576_v35, %v462_v60 }
 0x1d8   :  { %v752_v63 = vpop.f32.mrf.mxu1 }
 0x1d9   :  { %567 = vst [vmem:[%s1057_s5 + $0x60] sm:$0xff] %v551_v0  ;;  %v554_v1 = vadd.f32 %v752_v63, %v576_v35 }
 0x1da   :  { %v472_v62 = vpop.f32.mrf.mxu1 }
 0x1db   :  { %570 = vst [vmem:[%s1057_s5 + $0x78] sm:$0xff] %v554_v1  ;;  %v553_v2 = vadd.f32 %v576_v35, %v472_v62 }
 0x1dd   :  { %569 = vst [vmem:[%s1057_s5 + $0x70] sm:$0xff] %v553_v2 }

</bundles_post_ra>
